<compile_context>
chip_gen: v6e
topology: v6e:2x2x1
jax: 0.10.0
libtpu: 0.0.40
codegen_flags: <defaults>
</compile_context>

<pallas_src>
import functools

import jax
import jax.numpy as jnp
from jax.experimental import pallas as pl
from jax.experimental.pallas import tpu as pltpu


def _round_up(x, m):
    return ((x + m - 1) // m) * m


def _round_down(x, m):
    return (x // m) * m


def _rotary_kernel_iota(off_ref, inv_ref, o_ref, *, k):
    # Integer-t path: positions generated in-kernel (no t DMA stream).
    #   off_ref: (1, k*dim) f32, lane -> sub-row index c (0..k-1) repeated dim x
    #   inv_ref: (1, k*dim) f32, [inv_freq, inv_freq] tiled k times
    #   o_ref:   (tile_rows, k*dim) f32
    tile_rows = o_ref.shape[0]
    base = pl.program_id(0) * (tile_rows * k)                        # int32
    row = jax.lax.broadcasted_iota(jnp.int32, (tile_rows, 1), 0)     # (tile, 1)
    pos = (base + row * k).astype(jnp.float32)                       # (tile, 1)
    o_ref[...] = (pos + off_ref[...]) * inv_ref[...]


def _rotary_kernel_t(t_ref, inv_ref, o_ref, *, k, dim):
    # Arbitrary-positions path (k logical positions packed per physical row).
    #   t_ref:   (tile_rows, k)     f32
    #   inv_ref: (1, k*dim)         f32
    #   o_ref:   (tile_rows, k*dim) f32
    for c in range(k):  # k is a small static int (1, 2 or 4)
        o_ref[:, c * dim:(c + 1) * dim] = (
            t_ref[:, c:c + 1] * inv_ref[:, c * dim:(c + 1) * dim]
        )


def rotary_embedding(t, inv_freq, *, tile_cap=None, target_block_bytes=4 << 20):
    """Compute rotary frequencies.

    Args:
      t: int (sequence length) or 1-D array of positions, shape (seq,).
      inv_freq: 1-D array of inverse frequencies, shape (dim//2,).
      tile_cap: optional max *logical* sequence positions per grid step
        (rounded down to hardware-legal multiples internally).
      target_block_bytes: target size of one output block in VMEM.

    Returns:
      (seq, dim) float32 array, where dim = 2 * inv_freq.shape[0].
    """
    inv_freq = jnp.asarray(inv_freq).astype(jnp.float32)
    half = int(inv_freq.shape[0])
    dim = 2 * half
    inv2 = jnp.concatenate([inv_freq, inv_freq])  # (dim,), host-side duplication

    is_int = isinstance(t, int)
    if is_int:
        seq = int(t)
    else:
        t = jnp.asarray(t).astype(jnp.float32)
        seq = int(t.shape[0])

    if seq == 0:
        return jnp.zeros((0, dim), jnp.float32)

    # ---- lane packing: pack k logical rows per physical row so the stored
    # last dim is a dense 128 lanes (unmasked vst) whenever dim < 128.
    k = 1
    if dim < 128 and 128 % dim == 0:
        k = 128 // dim
        while k > 1 and seq % k != 0:
            k //= 2
    width = k * dim
    seq_rows = seq // k  # seq % k == 0 by construction

    # ---- tile sizing (physical packed rows per grid step).
    row_bytes = max(width, 128) * 4  # VMEM lane-pads rows to >= 128 lanes
    rows_by_bytes = max(8, _round_down(target_block_bytes // row_bytes, 8))
    # Keep >= ~4 grid steps so the parallel axis can shard across both v7x
    # TensorCores (negligible cost for small problems).
    rows_quarter = max(8, _round_up(pl.cdiv(seq_rows, 4), 8))
    tile_rows = min(rows_by_bytes, rows_quarter, _round_up(seq_rows, 8))
    if tile_cap is not None:
        cap_rows = max(8, _round_down(max(int(tile_cap), 8) // k, 8))
        tile_rows = min(tile_rows, cap_rows)

    grid = (pl.cdiv(seq_rows, tile_rows),)

    out_shape = jax.ShapeDtypeStruct((seq_rows, width), jnp.float32)
    out_spec = pl.BlockSpec((tile_rows, width), lambda i: (i, 0))
    inv_spec = pl.BlockSpec((1, width), lambda i: (0, 0))  # VMEM-resident
    inv_k = jnp.tile(inv2, k).reshape(1, width)

    cost = pl.CostEstimate(
        flops=2 * seq * dim,
        transcendentals=0,
        bytes_accessed=4 * seq * dim + 8 * width + (0 if is_int else 4 * seq),
    )
    cparams = pltpu.CompilerParams(
        dimension_semantics=("parallel",),
        vmem_limit_bytes=32 << 20,
    )

    if is_int:
        off_k = jnp.repeat(jnp.arange(k, dtype=jnp.float32), dim).reshape(1, width)
        out = pl.pallas_call(
            functools.partial(_rotary_kernel_iota, k=k),
            out_shape=out_shape,
            grid=grid,
            in_specs=[inv_spec, inv_spec],
            out_specs=out_spec,
            compiler_params=cparams,
            cost_estimate=cost,
        )(off_k, inv_k)
    else:
        t2 = t.reshape(seq_rows, k)  # contiguous reshape, no copy
        out = pl.pallas_call(
            functools.partial(_rotary_kernel_t, k=k, dim=dim),
            out_shape=out_shape,
            grid=grid,
            in_specs=[pl.BlockSpec((tile_rows, k), lambda i: (i, 0)), inv_spec],
            out_specs=out_spec,
            compiler_params=cparams,
            cost_estimate=cost,
        )(t2, inv_k)

    # Row-major contiguous reshape back to (seq, dim): bitcast, no HBM copy.
    return out.reshape(seq, dim)


def make_inv_freq(dim, theta=50000.0):
    # Deterministic parameter init, exactly mirroring the PyTorch __init__.
    return 1.0 / (theta ** (jnp.arange(0, dim, 2, dtype=jnp.float32) / dim))


def rotary_embedding_ref(t, inv_freq):
    # Pure-JAX reference for correctness checking.
    if isinstance(t, int):
        t = jnp.arange(t, dtype=jnp.float32)
    t = jnp.asarray(t).astype(jnp.float32)
    freqs = jnp.einsum("i,j->ij", t, inv_freq)
    return jnp.concatenate([freqs, freqs], axis=-1)


if __name__ == "__main__":
    dim = 32
    seq = 8
    theta = 50000.0

    inv_freq = make_inv_freq(dim, theta)

    # Case 1: integer input (t = seq length), as in forward(int). dim=32 -> lane-packed (k=4).
    out_int = jax.block_until_ready(rotary_embedding(seq, inv_freq))
    ref_int = rotary_embedding_ref(seq, inv_freq)

    # Case 2: tensor input of positions, as in forward(Tensor).
    key = jax.random.PRNGKey(0)
    t_positions = jax.random.uniform(
        key, (seq,), dtype=jnp.float32, minval=0.0, maxval=float(seq)
    )
    out_tensor = jax.block_until_ready(rotary_embedding(t_positions, inv_freq))
    ref_tensor = rotary_embedding_ref(t_positions, inv_freq)

    # Case 3: multi-tile + ragged last block (no host pad/slice anymore).
    seq3 = 300
    out_tiled = jax.block_until_ready(rotary_embedding(seq3, inv_freq, tile_cap=128))
    ref_tiled = rotary_embedding_ref(seq3, inv_freq)

    t3 = jax.random.uniform(
        jax.random.PRNGKey(1), (seq3,), dtype=jnp.float32, minval=0.0, maxval=1000.0
    )
    out_tiled_t = jax.block_until_ready(rotary_embedding(t3, inv_freq, tile_cap=128))
    ref_tiled_t = rotary_embedding_ref(t3, inv_freq)

    # Case 4: odd seq (packing falls back to k=1, masked-store path).
    out_odd = jax.block_until_ready(rotary_embedding(13, inv_freq))
    ref_odd = rotary_embedding_ref(13, inv_freq)

    # Case 5: dim >= 128 (no packing needed; lane-dense by construction).
    inv_freq_big = make_inv_freq(128, theta)
    out_big = jax.block_until_ready(rotary_embedding(16, inv_freq_big))
    ref_big = rotary_embedding_ref(16, inv_freq_big)

    assert out_int.shape == (seq, dim)
    assert out_tensor.shape == (seq, dim)
    assert out_tiled.shape == (seq3, dim)
    assert out_tiled_t.shape == (seq3, dim)
    assert out_odd.shape == (13, dim)
    assert out_big.shape == (16, 128)
    assert jnp.allclose(out_int, ref_int, atol=1e-6, rtol=1e-6)
    assert jnp.allclose(out_tensor, ref_tensor, atol=1e-6, rtol=1e-6)
    assert jnp.allclose(out_tiled, ref_tiled, atol=1e-5, rtol=1e-6)
    assert jnp.allclose(out_tiled_t, ref_tiled_t, atol=1e-5, rtol=1e-6)
    assert jnp.allclose(out_odd, ref_odd, atol=1e-6, rtol=1e-6)
    assert jnp.allclose(out_big, ref_big, atol=1e-6, rtol=1e-6)

    print("KERNEL_OK")
</pallas_src>

<mosaic_0001>
module attributes {stable_mosaic.version = 11 : i64} {
  func.func @_rotary_kernel_iota(%arg0: i32, %arg1: memref<1x128xf32, #tpu.memory_space<vmem>>, %arg2: memref<1x128xf32, #tpu.memory_space<vmem>>, %arg3: memref<8x128xf32, #tpu.memory_space<vmem>>) attributes {dimension_semantics = [#tpu.dimension_semantics<parallel>], iteration_bounds = array<i64: 1>, scalar_prefetch = 0 : i64, scratch_operands = 0 : i64, tpu.core_type = #tpu.core_type<tc>, window_params = [{pipeline_mode = #tpu.pipeline_mode<synchronous>, transform_indices = @transform_0, window_bounds = array<i64: 1, 128>}, {pipeline_mode = #tpu.pipeline_mode<synchronous>, transform_indices = @transform_1, window_bounds = array<i64: 1, 128>}, {transform_indices = @transform_2, window_bounds = array<i64: 8, 128>}]} {
    %c32_i32 = arith.constant 32 : i32
    %0 = arith.muli %arg0, %c32_i32 : i32
    %1 = tpu.iota {dimensions = array<i32: 0>} : vector<8x1xi32>
    %c4_i32 = arith.constant 4 : i32
    %2 = vector.broadcast %c4_i32 : i32 to vector<8x1xi32>
    %3 = arith.muli %1, %2 : vector<8x1xi32>
    %4 = vector.broadcast %0 : i32 to vector<8x1xi32>
    %5 = arith.addi %4, %3 : vector<8x1xi32>
    %6 = arith.sitofp %5 : vector<8x1xi32> to vector<8x1xf32>
    %c0 = arith.constant 0 : index
    %c0_0 = arith.constant 0 : index
    %7 = vector.load %arg1[%c0, %c0_0] : memref<1x128xf32, #tpu.memory_space<vmem>>, vector<1x128xf32>
    %8 = vector.broadcast %6 : vector<8x1xf32> to vector<8x128xf32>
    %9 = vector.broadcast %7 : vector<1x128xf32> to vector<8x128xf32>
    %10 = arith.addf %8, %9 : vector<8x128xf32>
    %c0_1 = arith.constant 0 : index
    %c0_2 = arith.constant 0 : index
    %11 = vector.load %arg2[%c0_1, %c0_2] : memref<1x128xf32, #tpu.memory_space<vmem>>, vector<1x128xf32>
    %12 = vector.broadcast %11 : vector<1x128xf32> to vector<8x128xf32>
    %13 = arith.mulf %10, %12 : vector<8x128xf32>
    %c0_3 = arith.constant 0 : index
    %c0_4 = arith.constant 0 : index
    %14 = vector.load %arg3[%c0_3, %c0_4] : memref<8x128xf32, #tpu.memory_space<vmem>>, vector<8x128xf32>
    tpu.vector_store %arg3[%c0_3, %c0_4], %13 {strides = array<i32>} : memref<8x128xf32, #tpu.memory_space<vmem>>, vector<8x128xf32>,
    return
  }
  func.func @transform_0(%arg0: i32) -> (i32, i32) {
    %c0_i32 = arith.constant 0 : i32
    %c0_i32_0 = arith.constant 0 : i32
    %c0_i32_1 = arith.constant 0 : i32
    return %c0_i32, %c0_i32_0 : i32, i32
  }
  func.func @transform_1(%arg0: i32) -> (i32, i32) {
    %c0_i32 = arith.constant 0 : i32
    %c0_i32_0 = arith.constant 0 : i32
    %c0_i32_1 = arith.constant 0 : i32
    return %c0_i32, %c0_i32_0 : i32, i32
  }
  func.func @transform_2(%arg0: i32) -> (i32, i32) {
    %c0_i32 = arith.constant 0 : i32
    %c0_i32_0 = arith.constant 0 : i32
    return %arg0, %c0_i32 : i32, i32
  }
}

</mosaic_0001>

<bundles_post_ra>
// kernel: tpu_custom_call.1
= control target key start
LH: loop header
LB: loop body
LE: loop exit
PB: predicated region body
PF: predicated region fallthrough
CT: control target
= control target key end

     0   :  { %7 = vsyncpa [#allocation3], 0  ;;  %s143_s0 = inlined_call_operand.hbm [shape: f32[1,128], index: 0, kind: input, shape index: {}]   ;;  %s144_s1 = inlined_call_operand.vmem [shape: f32[1,128], index: 1, kind: input, shape index: {}]   ;;  %s145_s2 = inlined_call_operand.hbm [shape: f32[2,128], index: 2, kind: output, shape index: {}]  }
   0x1   :  { %8 = vsyncpa [#allocation4], 0  ;;  %s115_s9 = smov [#allocation2]  }
   0x2   :  { %s15_s10 = sshll.u32 %s115_s9, 4  ;;  %s16_s10 = int_to_ptr.vmem [resolvable:$true] %s15_s10 }
   0x3   :  { %s79_s11 = scalar_lea.vmem %s16_s10, 16  ;;  %s83_s12 = scalar_lea.vmem %s16_s10, 32 }
   0x4   :  { %p80_p0 = scmp.ne.s32.totalorder %s16_s10, %s79_s11  ;;  %p84_p1 = scmp.lt.s32.totalorder %s16_s10, %s16_s10 }
   0x5   :  { %p85_p2 = scmp.lt.s32.totalorder %s83_s12, %s79_s11 }
   0x7   :  { %p86_p3 = por %p85_p2, %p84_p1 }
   0x9   :  { %p87_p4 = pnand %p86_p3, %p80_p0 }
   0xb   :  { %90 = shalt.err (!%p87_p4)
}
   0xc   :  { %18 = dma.hbm_to_vmem [thread:$0]  %s143_s0, 16, %s16_s10, [#allocation3]  }
   0xd   :  { %111 = dma.done.wait [#allocation3], 16  }
   0xe   :  { %112 = vsyncadd [#allocation3], 4294967280  ;;  %v25_v0 = vlaneseq  ;;  %v65_v4 = vld [vmem:[#allocation2] ss:$0 sm:$0xff] }
   0xf   :  { %v66_v5 = vld [vmem:[%s144_s1] ss:$0 sm:$0xff] }
  0x10   :  { %v26_v1 = vshrl.u32 %v25_v0, 7 }
  0x12   :  { %v27_v2 = vmul.u32 4, %v26_v1 }
  0x14   :  { %v30_v3 = vcvt.s32.f32 %v27_v2 }
  0x16   :  { %v38_v6 = vadd.f32 %v65_v4, %v30_v3 }
  0x18   :  { %v46_v7 = vmul.f32 %v66_v5, %v38_v6 }
  0x1a   :  { %47 = vst [vmem:[#allocation5] sm:$0xff] %v46_v7 }
  0x1b   :  { %52 = vsyncadd [#allocation4], 96  ;;  %s116_s17 = smov [#allocation5]  }
  0x1c   :  { %s53_s18 = sshll.u32 %s116_s17, 4  ;;  %s54_s18 = int_to_ptr.vmem [resolvable:$true] %s53_s18 }
  0x1d   :  { %s91_s19 = scalar_lea.vmem %s54_s18, 32  ;;  %s95_s0 = scalar_lea.vmem %s54_s18, 128 }
  0x1e   :  { %p92_p5 = scmp.ne.s32.totalorder %s54_s18, %s91_s19  ;;  %p96_p6 = scmp.lt.s32.totalorder %s54_s18, %s54_s18 }
  0x1f   :  { %p97_p7 = scmp.lt.s32.totalorder %s95_s0, %s91_s19 }
  0x21   :  { %p98_p8 = por %p97_p7, %p96_p6 }
  0x23   :  { %p99_p9 = pnand %p98_p8, %p92_p5 }
  0x25   :  { %102 = shalt.err (!%p99_p9)
}
  0x26   :  { %s117_s20 = smov 32   ;;  %s118_s21 = smov 2  }
  0x27   :  { %59 = dma.vmem_to_hbm [thread:$0]  %s54_s18, 32, %s145_s2, [#allocation4], %s117_s20, %s117_s20, %s118_s21  }
  0x28   :  { %113 = dma.done.wait [#allocation4], 128  }
  0x29   :  { %114 = vsyncadd [#allocation4], 4294967168 }
  0x2a   :  { %63 = vsyncpa [#allocation3], 1 }
  0x2b   :  { %64 = vsyncpa [#allocation4], 1 }

</bundles_post_ra>
